<compile_context>
chip_gen: v5e
topology: v5e:2x2
jax: 0.10.0
libtpu: 0.0.40
codegen_flags: <defaults>
</compile_context>

<pallas_src>
import math
from functools import partial

import numpy as np
import jax
import jax.numpy as jnp
from jax.experimental import pallas as pl
from jax.experimental.pallas import tpu as pltpu


def _round_up(a, b):
    return (a + b - 1) // b * b


def _vmem_capacity_bytes():
    """Physical per-core VMEM (conservative fallback if the query fails)."""
    try:
        info = pltpu.get_tpu_info()
        for name in ("vmem_capacity_bytes", "vmem_bytes", "vmem_size_bytes"):
            v = getattr(info, name, None)
            if v:
                return int(v)
    except Exception:
        pass
    return 64 << 20   # v7x-like: smallest current VMEM -> safe everywhere


def _sublane_multiple(dtype):
    # f32 -> 8, bf16 -> 16, int8/fp8 -> 32
    return 8 * (4 // min(np.dtype(dtype).itemsize, 4))


def _choose_tile_rows(rows, sub, budget_rows, min_row_tiles):
    """Largest multiple of `sub` dividing `rows` that fits the VMEM budget.

    If rows is not a multiple of `sub`, fall back to a single full-extent block
    (legal: block dim == array dim; Mosaic masks the partial stores).
    On v7x (min_row_tiles=2) prefer a tile that leaves >=2 row tiles so both
    TensorCores get work on the "parallel" axis.
    """
    if rows % sub != 0:
        return rows
    cands = [d for d in range(sub, rows + 1, sub) if rows % d == 0]
    fit = [d for d in cands if d <= budget_rows] or [sub]
    tile = max(fit)
    if min_row_tiles > 1:
        split = [d for d in fit if rows // d >= min_row_tiles]
        if split:
            tile = max(split)
    return tile


def _lif_kernel(x_ref, c_ref, o_ref, u_sc, *, fused):
    """One (row_tile, t) grid step of the LIF recurrence.

    x_ref : (1, R, HW)  W*o from the previous layer (native dtype)
    c_ref : (1, R, 8)   packed f32 per-row coefficients
                        fused:  [A, A*(1-g), L, L+(1-g)*reVth, Vth, B_t, 0, 0]
                        exact:  [A, 1-g,     L, (1-g)*reVth,   Vth, B_t, 0, 0]
    o_ref : (1, R, HW)  spikes for this time step ({0,1})
    u_sc  : (R, HW)     membrane potential carried across t (f32)
    """
    t = pl.program_id(1)

    @pl.when(t == 0)
    def _():
        u_sc[...] = jnp.zeros_like(u_sc)

    c = c_ref[0]                         # (R, 8) f32
    vth = c[:, 4:5]                      # sigmoid(Vth) > 0
    b = c[:, 5:6]                        # 1 - beta*(1 - conduct[t])

    x = x_ref[0].astype(jnp.float32)     # (R, HW)
    u = u_sc[...]

    if fused:
        # fewer full-width VALU ops (coefficients pre-fused per row); rounding
        # may differ from torch by ~ulps on threshold ties.
        spiked = u > vth                                 # o_{t-1}
        a = jnp.where(spiked, c[:, 1:2], c[:, 0:1])      # A*(1-g)  /  A
        k = jnp.where(spiked, c[:, 3:4], c[:, 2:3])      # L+(1-g)*reVth / L
        u_new = a * u + x * b - k
        o = u_new > vth
    else:
        # exact fp32 op order of the PyTorch expression (o_{t-1} is binary)
        A, OMG, L, R = c[:, 0:1], c[:, 1:2], c[:, 2:3], c[:, 3:4]
        spiked = (u - vth) > 0.0                          # o_{t-1}
        Au = A * u
        xB = x * b
        u_new = jnp.where(spiked,
                          ((Au * OMG) - L + xB) - R,      # o_{t-1} == 1
                          (Au - L) + xB)                  # o_{t-1} == 0
        o = (u_new - vth) > 0.0

    u_sc[...] = u_new
    o_ref[0] = o.astype(o_ref.dtype)


def lif_spike_cw_pallas(x, params, *, soft_mode=True, exact_parity=False,
                        out_dtype=jnp.bfloat16, vmem_budget_bytes=None):
    """x: [T, N, C, H, W] (streamed in its native dtype; pass bf16 upstream to
    halve input HBM traffic).  params: raw (pre-sigmoid) per-channel params.

    Returns spikes [T, N, C, H, W] in `out_dtype`.  Spikes are exactly {0,1},
    so bf16 (default) is lossless; out_dtype=jnp.int8 halves output HBM traffic
    if the consumer accepts it (sublane multiple becomes 32).
    """
    T, N, C, H, W = x.shape
    HW = H * W
    rows = N * C
    sig = jax.nn.sigmoid

    # --- gate pre-processing (tiny, plain JAX) -------------------------------
    # Forward of ArchAct(sigmoid(a)) == (a > 0), so forward only depends on
    # soft_mode.
    if soft_mode:
        al, be, ga = sig(params["alpha"]), sig(params["beta"]), sig(params["gamma"])
    else:
        al = (params["alpha"] > 0.0).astype(jnp.float32)
        be = (params["beta"] > 0.0).astype(jnp.float32)
        ga = (params["gamma"] > 0.0).astype(jnp.float32)

    tau_s, vth_s = sig(params["tau"]), sig(params["Vth"])
    leak_s, revth_s = sig(params["leak"]), sig(params["reVth"])
    cond_s = sig(params["conduct"])                      # (T, C)

    # --- fused per-channel coefficients --------------------------------------
    A   = 1.0 - al * (1.0 - tau_s)                       # (C,)
    OMG = 1.0 - ga                                       # (C,)
    L   = (1.0 - al) * leak_s                            # (C,)
    R   = OMG * revth_s                                  # (C,)
    Bt  = 1.0 - be[None, :] * (1.0 - cond_s)             # (T, C)

    # VTH = sigmoid(.) > 0 and u==0 at t==0 => recomputing o_{t-1} from u is
    # valid (no spike at the first step, matching out[max(step-1,0)] == 0).
    if exact_parity:
        cols = [A, OMG, L, R, vth_s]
    else:
        cols = [A, A * OMG, L, L + R, vth_s]

    # channel -> row (rows = N*C; row r holds channel r % C), packed lane-dense
    # into a single (T, rows, 8) f32 coefficient input (one small DMA per step).
    stat = jnp.stack([jnp.tile(v.astype(jnp.float32), N) for v in cols], -1)   # (rows, 5)
    stat = jnp.broadcast_to(stat[None], (T, rows, 5))
    b_rows = jnp.tile(Bt.astype(jnp.float32), (1, N))[..., None]               # (T, rows, 1)
    coef = jnp.concatenate(
        [stat, b_rows, jnp.zeros((T, rows, 2), jnp.float32)], axis=-1)         # (T, rows, 8)

    # --- generation-aware tiling / VMEM budgeting ----------------------------
    in_b = np.dtype(x.dtype).itemsize
    out_b = np.dtype(out_dtype).itemsize
    sub = max(_sublane_multiple(x.dtype), _sublane_multiple(out_dtype))

    vmem_cap = _vmem_capacity_bytes()
    big_vmem = vmem_cap >= (100 << 20)            # v5e / v6e (128 MiB)
    if vmem_budget_bytes is None:
        vmem_budget_bytes = (48 << 20) if big_vmem else (24 << 20)
    min_row_tiles = 1 if big_vmem else 2          # v7x: keep both TCs busy

    # per-row VMEM: 2 x bufs + 2 out bufs + f32 u scratch + lane-padded coefs
    hw_vmem = _round_up(HW, 128)
    bytes_per_row = hw_vmem * (2 * in_b + 2 * out_b + 4) + 2 * 128 * 4
    budget_rows = max(sub, vmem_budget_bytes // bytes_per_row)
    tile_rows = _choose_tile_rows(rows, sub, budget_rows, min_row_tiles)

    working_set = tile_rows * bytes_per_row
    vmem_limit = int(min(0.9 * vmem_cap,
                         max(working_set * 1.25 + (2 << 20), 24 << 20)))

    x_flat = x.reshape(T, rows, HW)               # contiguous reshape: no copy
    grid = (pl.cdiv(rows, tile_rows), T)          # rows parallel, T carries u

    kernel = partial(_lif_kernel, fused=not exact_parity)
    out = pl.pallas_call(
        kernel,
        out_shape=jax.ShapeDtypeStruct((T, rows, HW), out_dtype),
        grid_spec=pltpu.PrefetchScalarGridSpec(
            num_scalar_prefetch=0,
            grid=grid,
            in_specs=[
                # NOTE: if profiling shows exposed DMA on x, add
                # pipeline_mode=pl.Buffered(3) here (sweep 2 vs 3).
                pl.BlockSpec((1, tile_rows, HW), lambda r, t: (t, r, 0)),   # x[t]
                pl.BlockSpec((1, tile_rows, 8), lambda r, t: (t, r, 0)),    # coefs
            ],
            out_specs=pl.BlockSpec((1, tile_rows, HW), lambda r, t: (t, r, 0)),
            scratch_shapes=[pltpu.VMEM((tile_rows, HW), jnp.float32)],      # u
        ),
        compiler_params=pltpu.CompilerParams(
            dimension_semantics=("parallel", "arbitrary"),   # T carries state
            vmem_limit_bytes=vmem_limit),
    )(x_flat, coef)

    return out.reshape(T, N, C, H, W)


def lif_spike_cw_ref(x, params, *, soft_mode=True):
    """Pure-JAX reference mirroring the PyTorch forward expression exactly."""
    T, N, C, H, W = x.shape
    sig = jax.nn.sigmoid
    if soft_mode:
        al, be, ga = sig(params["alpha"]), sig(params["beta"]), sig(params["gamma"])
    else:
        al = (params["alpha"] > 0.0).astype(jnp.float32)
        be = (params["beta"] > 0.0).astype(jnp.float32)
        ga = (params["gamma"] > 0.0).astype(jnp.float32)
    tau_s, vth_s = sig(params["tau"]), sig(params["Vth"])
    leak_s, revth_s = sig(params["leak"]), sig(params["reVth"])

    def bc(v):  # (C,) -> (1, C, 1, 1)
        return v[None, :, None, None]

    u = jnp.zeros((N, C, H, W), jnp.float32)
    o_prev = jnp.zeros((N, C, H, W), jnp.float32)
    outs = []
    for t in range(T):
        cond = sig(params["conduct"][t])
        I_t = x[t] * (1.0 - bc(be) * (1.0 - bc(cond)))
        u = (1.0 - bc(al) * (1.0 - bc(tau_s))) * u * (1.0 - bc(ga) * o_prev) \
            - (1.0 - bc(al)) * bc(leak_s) + I_t - (1.0 - bc(ga)) * bc(revth_s) * o_prev
        o = (u - bc(vth_s) > 0.0).astype(jnp.float32)
        outs.append(o)
        o_prev = o
    return jnp.stack(outs)


def make_params(T, C, gate=(1.0, 1.0, 1.0), param=(0.25, 0.5, 0.5, 0.5), key=None):
    """Deterministic init following LIFSpike_CW.__init__ (+ small jitter)."""
    inv_sig = lambda p: -math.log(1.0 / p - 1.0)
    g = [inv_sig((i - 0.5) * 0.5 + 0.5) for i in gate]
    p = {
        "alpha": jnp.full((C,), g[0], jnp.float32),
        "beta": jnp.full((C,), g[1], jnp.float32),
        "gamma": jnp.full((C,), g[2], jnp.float32),
        "tau": jnp.full((C,), inv_sig(param[0]), jnp.float32),
        "Vth": jnp.full((C,), inv_sig(param[1]), jnp.float32),
        "leak": jnp.full((C,), inv_sig(param[2]), jnp.float32),
        "reVth": jnp.full((C,), inv_sig(param[1]), jnp.float32),
        "conduct": jnp.full((T, C), inv_sig(param[3]), jnp.float32),
    }
    if key is not None:  # small deterministic per-channel jitter for a richer test
        keys = jax.random.split(key, len(p))
        p = {k: v + 0.1 * jax.random.normal(kk, v.shape, jnp.float32)
             for (k, v), kk in zip(p.items(), keys)}
    return p


# TODO(synk): ArchAct / SpikeAct_extended custom *backward* surrogate gradients
# are training-time autograd glue; only the forward pass is implemented here.

if __name__ == "__main__":
    T, N, C, H, W = 4, 2, 8, 16, 16
    key = jax.random.PRNGKey(0)
    kx, kp = jax.random.split(key)
    x = jax.random.normal(kx, (T, N, C, H, W), jnp.float32)
    params = make_params(T, C, key=kp)

    ref = lif_spike_cw_ref(x, params, soft_mode=True)

    # Exact-op-order path: spikes bit-identical to the torch expression.
    out_exact = jax.block_until_ready(
        lif_spike_cw_pallas(x, params, soft_mode=True, exact_parity=True))
    np.testing.assert_allclose(np.asarray(out_exact.astype(jnp.float32)),
                               np.asarray(ref), atol=1e-5, rtol=0)

    # Default fast path (pre-fused coefficients): may differ from the reference
    # only on ulp-scale threshold ties, so allow a vanishing mismatch fraction.
    out_fast = jax.block_until_ready(
        lif_spike_cw_pallas(x, params, soft_mode=True))
    mismatch = float(jnp.mean(
        (out_fast.astype(jnp.float32) != ref).astype(jnp.float32)))
    assert mismatch <= 1e-3, f"fused-path spike mismatch fraction {mismatch}"

    print("KERNEL_OK")
</pallas_src>

<mosaic_0001>
module attributes {stable_mosaic.version = 11 : i64} {
  func.func @_lif_kernel(%arg0: i32, %arg1: i32, %arg2: memref<1x16x256xf32, #tpu.memory_space<vmem>>, %arg3: memref<1x16x8xf32, #tpu.memory_space<vmem>>, %arg4: memref<1x16x256xbf16, #tpu.memory_space<vmem>>, %arg5: memref<16x256xf32, #tpu.memory_space<vmem>>) attributes {dimension_semantics = [#tpu.dimension_semantics<parallel>, #tpu.dimension_semantics<arbitrary>], iteration_bounds = array<i64: 1, 4>, scalar_prefetch = 0 : i64, scratch_operands = 1 : i64, tpu.core_type = #tpu.core_type<tc>, window_params = [{transform_indices = @transform_0, window_bounds = array<i64: 1, 16, 256>}, {transform_indices = @transform_1, window_bounds = array<i64: 1, 16, 8>}, {transform_indices = @transform_2, window_bounds = array<i64: 1, 16, 256>}]} {
    %c0_i32 = arith.constant 0 : i32
    %0 = arith.cmpi eq, %arg1, %c0_i32 : i32
    %1 = arith.extui %0 : i1 to i32
    %c0_i32_0 = arith.constant 0 : i32
    %2 = arith.cmpi ne, %1, %c0_i32_0 : i32
    scf.if %2 {
      %cst_14 = arith.constant 0.000000e+00 : f32
      %44 = vector.broadcast %cst_14 : f32 to vector<16x256xf32>
      %c0_15 = arith.constant 0 : index
      %c0_16 = arith.constant 0 : index
      %45 = vector.load %arg5[%c0_15, %c0_16] : memref<16x256xf32, #tpu.memory_space<vmem>>, vector<16x256xf32>
      tpu.vector_store %arg5[%c0_15, %c0_16], %44 {strides = array<i32>} : memref<16x256xf32, #tpu.memory_space<vmem>>, vector<16x256xf32>,
    } else {
    }
    %c0 = arith.constant 0 : index
    %c0_1 = arith.constant 0 : index
    %c0_2 = arith.constant 0 : index
    %3 = vector.load %arg3[%c0, %c0_1, %c0_2] : memref<1x16x8xf32, #tpu.memory_space<vmem>>, vector<1x16x8xf32>
    %4 = vector.shape_cast %3 : vector<1x16x8xf32> to vector<16x8xf32>
    %5 = vector.extract_strided_slice %4 {offsets = [0, 4], sizes = [16, 1], strides = [1, 1]} : vector<16x8xf32> to vector<16x1xf32>
    %6 = vector.extract_strided_slice %4 {offsets = [0, 5], sizes = [16, 1], strides = [1, 1]} : vector<16x8xf32> to vector<16x1xf32>
    %c0_3 = arith.constant 0 : index
    %c0_4 = arith.constant 0 : index
    %c0_5 = arith.constant 0 : index
    %7 = vector.load %arg2[%c0_3, %c0_4, %c0_5] : memref<1x16x256xf32, #tpu.memory_space<vmem>>, vector<1x16x256xf32>
    %8 = vector.shape_cast %7 : vector<1x16x256xf32> to vector<16x256xf32>
    %c0_6 = arith.constant 0 : index
    %c0_7 = arith.constant 0 : index
    %9 = vector.load %arg5[%c0_6, %c0_7] : memref<16x256xf32, #tpu.memory_space<vmem>>, vector<16x256xf32>
    %10 = vector.extract_strided_slice %4 {offsets = [0, 0], sizes = [16, 1], strides = [1, 1]} : vector<16x8xf32> to vector<16x1xf32>
    %11 = vector.extract_strided_slice %4 {offsets = [0, 1], sizes = [16, 1], strides = [1, 1]} : vector<16x8xf32> to vector<16x1xf32>
    %12 = vector.extract_strided_slice %4 {offsets = [0, 2], sizes = [16, 1], strides = [1, 1]} : vector<16x8xf32> to vector<16x1xf32>
    %13 = vector.extract_strided_slice %4 {offsets = [0, 3], sizes = [16, 1], strides = [1, 1]} : vector<16x8xf32> to vector<16x1xf32>
    %14 = vector.broadcast %5 : vector<16x1xf32> to vector<16x256xf32>
    %15 = arith.subf %9, %14 : vector<16x256xf32>
    %cst = arith.constant 0.000000e+00 : f32
    %16 = vector.broadcast %cst : f32 to vector<16x256xf32>
    %17 = arith.cmpf ogt, %15, %16 : vector<16x256xf32>
    %18 = vector.broadcast %10 : vector<16x1xf32> to vector<16x256xf32>
    %19 = arith.mulf %18, %9 : vector<16x256xf32>
    %20 = vector.broadcast %6 : vector<16x1xf32> to vector<16x256xf32>
    %21 = arith.mulf %8, %20 : vector<16x256xf32>
    %22 = vector.broadcast %11 : vector<16x1xf32> to vector<16x256xf32>
    %23 = arith.mulf %19, %22 : vector<16x256xf32>
    %24 = vector.broadcast %12 : vector<16x1xf32> to vector<16x256xf32>
    %25 = arith.subf %23, %24 : vector<16x256xf32>
    %26 = arith.addf %25, %21 : vector<16x256xf32>
    %27 = vector.broadcast %13 : vector<16x1xf32> to vector<16x256xf32>
    %28 = arith.subf %26, %27 : vector<16x256xf32>
    %29 = vector.broadcast %12 : vector<16x1xf32> to vector<16x256xf32>
    %30 = arith.subf %19, %29 : vector<16x256xf32>
    %31 = arith.addf %30, %21 : vector<16x256xf32>
    %32 = arith.select %17, %28, %31 : vector<16x256xi1>, vector<16x256xf32>
    %33 = vector.broadcast %5 : vector<16x1xf32> to vector<16x256xf32>
    %34 = arith.subf %32, %33 : vector<16x256xf32>
    %cst_8 = arith.constant 0.000000e+00 : f32
    %35 = vector.broadcast %cst_8 : f32 to vector<16x256xf32>
    %36 = arith.cmpf ogt, %34, %35 : vector<16x256xf32>
    %c0_9 = arith.constant 0 : index
    %c0_10 = arith.constant 0 : index
    %37 = vector.load %arg5[%c0_9, %c0_10] : memref<16x256xf32, #tpu.memory_space<vmem>>, vector<16x256xf32>
    tpu.vector_store %arg5[%c0_9, %c0_10], %32 {strides = array<i32>} : memref<16x256xf32, #tpu.memory_space<vmem>>, vector<16x256xf32>,
    %38 = arith.extui %36 : vector<16x256xi1> to vector<16x256xi32>
    %39 = arith.sitofp %38 : vector<16x256xi32> to vector<16x256xf32>
    %40 = arith.truncf %39 : vector<16x256xf32> to vector<16x256xbf16>
    %c0_11 = arith.constant 0 : index
    %c0_12 = arith.constant 0 : index
    %c0_13 = arith.constant 0 : index
    %41 = vector.load %arg4[%c0_11, %c0_12, %c0_13] : memref<1x16x256xbf16, #tpu.memory_space<vmem>>, vector<1x16x256xbf16>
    %42 = vector.shape_cast %41 : vector<1x16x256xbf16> to vector<16x256xbf16>
    %43 = vector.shape_cast %40 : vector<16x256xbf16> to vector<1x16x256xbf16>
    tpu.vector_store %arg4[%c0_11, %c0_12, %c0_13], %43 {strides = array<i32>} : memref<1x16x256xbf16, #tpu.memory_space<vmem>>, vector<1x16x256xbf16>,
    return
  }
  func.func @transform_0(%arg0: i32, %arg1: i32) -> (i32, i32, i32) {
    %c0_i32 = arith.constant 0 : i32
    %c0_i32_0 = arith.constant 0 : i32
    return %arg1, %arg0, %c0_i32 : i32, i32, i32
  }
  func.func @transform_1(%arg0: i32, %arg1: i32) -> (i32, i32, i32) {
    %c0_i32 = arith.constant 0 : i32
    %c0_i32_0 = arith.constant 0 : i32
    return %arg1, %arg0, %c0_i32 : i32, i32, i32
  }
  func.func @transform_2(%arg0: i32, %arg1: i32) -> (i32, i32, i32) {
    %c0_i32 = arith.constant 0 : i32
    %c0_i32_0 = arith.constant 0 : i32
    return %arg1, %arg0, %c0_i32 : i32, i32, i32
  }
}

</mosaic_0001>

<bundles_post_ra>
// kernel: tpu_custom_call.1
= control target key start
LH: loop header
LB: loop body
LE: loop exit
PB: predicated region body
PF: predicated region fallthrough
CT: control target
= control target key end

     0   :  { %7 = vsyncpa [#allocation4], 0  ;;  %s872_s0 = inlined_call_operand.hbm [shape: f32[4,16,256], index: 0, kind: input, shape index: {}]   ;;  %s873_s1 = inlined_call_operand.vmem [shape: f32[4,16,8], index: 1, kind: input, shape index: {}]   ;;  %s874_s2 = inlined_call_operand.hbm [shape: bf16[4,16,256], index: 2, kind: output, shape index: {}]  }
   0x1   :  { %9 = vsyncpa [#allocation4 + $0x1], 0 }
   0x2   :  { %10 = vsyncpa [#allocation5], 0 }
   0x3   :  { %12 = vsyncpa [#allocation5 + $0x1], 0  ;;  %s730_s9 = smov 0   ;;  %s732_s10 = smov 0  }
   0x4   :  { %s734_s11 = smov 0   ;;  %s736_s12 = smov 0  }
   0x5   :  { %s738_s13 = smov 0   ;;  %s740_s14 = smov 0  }
   0x6 LB: > { %s481_s15 = sadd.s32 4294967295, %s701_s14   ;;  %s482_s16 = sadd.s32 4294967294, %s701_s14   ;;  %s701_s14 = sphi %s740_s14, %s18_s14   ;;  %s697_s13 = sphi %s738_s13, %s883_s13   ;;  %s693_s12 = sphi %s736_s12, %s882_s12   ;;  %s689_s11 = sphi %s734_s11, %s881_s11   ;;  %s685_s10 = sphi %s732_s10, %s880_s10   ;;  %s681_s9 = sphi %s730_s9, %s879_s9  }
   0x7   : > { %s27_s17 = sadd.s32 1, %s697_s13  ;;  %s39_s18 = sadd.s32 1, %s689_s11 }
   0x8   : > { %p28_p0 = scmp.ge.s32.totalorder %s27_s17, 4  ;;  %p46_p1 = scmp.ne.s32.totalorder %s689_s11, %s685_s10 }
   0x9   : > { %p47_p2 = scmp.eq.s32.totalorder %s701_s14, 0  ;;  %p52_p3 = scmp.ne.s32.totalorder %s685_s10, %s681_s9 }
   0xa   : > { %s885_s17 = smov (%p28_p0, %s27_s17), 0  ;;  %p53_p5 = scmp.eq.s32.totalorder %s481_s15, 0 }
   0xb   : > { %p771_p4 = por %p47_p2, %p46_p1  ;;  %s34_s20 = ssub.s32 %s697_s13, %s885_s17 }
   0xc   : > { %p106_p6 = scmp.eq.s32.totalorder %s481_s15, 3  ;;  %p37_p7 = scmp.eq.s32.totalorder %s34_s20, 0 }
   0xd   : > { %p777_p8 = por %p53_p5, %p52_p3  ;;  %p112_p10 = scmp.eq.s32.totalorder %s482_s16, 3 }
   0xe   : > { %p781_p9 = por %p106_p6, %p46_p1  ;;  %p518_p12 = scmp.lt.s32.totalorder %s701_s14, 4 }
   0xf   : > { %s786_s23 = scalar_select %p37_p7, %s689_s11, %s39_s18  }
  0x10   : > { %p788_p11 = por %p112_p10, %p52_p3  ;;  %s132_s25 = sand.u32 1, %s689_s11  }
  0x11   : > { %s485_s26 = sshll.u32 %s132_s25, 5  ;;  %s503_s27 = sshll.u32 %s697_s13, 5 }
  0x12   : > { %s144_s30 = scalar_lea.hbm %s872_s0, %s503_s27  ;;  %s136_s3 = scalar_lea.vmem [#allocation3], %s485_s26 }
  0x13   : > { %s147_s4 = sshll.u32 %s136_s3, 4  ;;  %s145_s5 = sshll.u32 %s144_s30, 4  ;;  %s148_s4 = int_to_ptr.vmem [resolvable:$true] %s147_s4  ;;  %s146_s5 = int_to_ptr.hbm [resolvable:$true] %s145_s5 }
  0x14   : > { %p511_p13 = pnand %p518_p12, %p771_p4  ;;  %p488_p0 = scmp.ge.s32.totalorder %s701_s14, 1 }
  0x15   : > { %s133_s6 = scalar_lea.sflag [#allocation4], %s132_s25  ;;  %s703_s7 = smov 256  }
  0x16   : > { %s704_s8 = smov 16   ;;  %p168_p1 = scmp.lt.s32.totalorder %s701_s14, 5 }
  0x17   : > { %513 = dma.hbm_to_vmem [thread:$0]  (!%p511_p13), %s146_s5, 512, %s148_s4, %s133_s6, %s703_s7, %s703_s7, %s704_s8  }
  0x18   : > { %p169_p2 = pnand %p488_p0, %p168_p1 }
  0x19   : > { %s803_s15 = sand.u32 (!%p169_p2), 1, %s685_s10  }
  0x1a   : > { %172 = sbr.rel (%p169_p2) target bundleno = 205 (0xcd), region = 28  ;;  %s489_s16 = sshll.u32 (!%p169_p2), %s803_s15, 5 }
  0x1b   : > { %s175_s18 = scalar_lea.sflag (!%p169_p2), [#allocation4], %s803_s15  ;;  %s807_s20 = scalar_lea.vmem (!%p169_p2), [#allocation3], %s489_s16 }
  0x1f   : > { %672 = dma.done.wait (%p777_p8), %s175_s18, 512  }
  0x20   : > { %674 = vsyncadd (%p777_p8), %s175_s18, 4294966784  ;;  %s490_s19 = sshll.u32 %s803_s15, 4  ;;  %p211_p3 = scmp.lt.s32.totalorder %s693_s12, 3 }
  0x21   : > { %s819_s30 = scalar_lea.vmem [#allocation6], %s490_s19  ;;  %p493_p4 = scmp.ne.s32.totalorder %s693_s12, 0 }
  0x22   : > { %s212_s25 = scalar_select %p211_p3, %s693_s12, 3 }
  0x23   : > { %224 = sbr.rel (%p493_p4) target bundleno = 45 (0x2d), region = 36 }
  0x24   : > { %s504_s26 = sshll.u32 %s212_s25, 4 }
  0x25   : > { %s218_s29 = scalar_lea.vmem %s873_s1, %s504_s26 }
  0x28   : > { %v705_v0 = vmov 0.0  }
  0x29   : > { %225 = vst [vmem:[#allocation2 + $0x10] sm:$0xff] %v705_v0 }
  0x2a   : > { %226 = vst [vmem:[#allocation2] sm:$0xff] %v705_v0 }
  0x2b   : > { %227 = vst [vmem:[#allocation2 + $0x18] sm:$0xff] %v705_v0 }
  0x2c   : > { %228 = vst [vmem:[#allocation2 + $0x8] sm:$0xff] %v705_v0 }
  0x2d PF: > { %v229_v1 = vld [vmem:[%s218_s29] sm:$0xff]  ;;  %v706_v2 = vmov 0   ;;  %v707_v3 = vmov 4   ;;  %v708_v4 = vmov 1   ;;  %v230_v5 = vld [vmem:[%s218_s29 + $0x8] sm:$0xff]  ;;  %v709_v6 = vmov 5  }
  0x2e   : > { %581 = vset.pattern.permute.xlu1 %v706_v2  ;;  %580 = vset.pattern.permute.xlu0 %v707_v3  ;;  %v710_v7 = vmov 2   ;;  %v711_v8 = vmov 3   ;;  %v231_v22 = vld [vmem:[%s807_s20] sm:$0xff]  ;;  %v232_v23 = vld [vmem:[%s807_s20 + $0x8] sm:$0xff]  ;;  %v233_v45 = vld [vmem:[%s807_s20 + $0x10] sm:$0xff]  ;;  %v712_v60 = vmov 0.0  }
  0x2f   : > { %258 = vperm.xlu1 %581, %v229_v1   ;;  %241 = vperm.xlu0 %580, %v229_v1   ;;  %v234_v46 = vld [vmem:[%s807_s20 + $0x18] sm:$0xff]  ;;  %s505_s21 = sshll.u32 %s693_s12, 4  ;;  %s373_s12 = sshll.u32 %s819_s30, 4  ;;  %s374_s12 = int_to_ptr.vmem [resolvable:$true] %s373_s12 }
  0x30   : > { %582 = vset.pattern.permute.xlu2 %v708_v4  ;;  %v235_v13 = vld [vmem:[#allocation2 + $0x10] sm:$0xff]  ;;  %s372_s5 = scalar_lea.hbm %s874_s2, %s505_s21  ;;  %s358_s7 = scalar_lea.sflag [#allocation5], %s803_s15 }
  0x31   : > { %282 = vperm.xlu2 %582, %v229_v1   ;;  %v236_v14 = vld [vmem:[#allocation2] sm:$0xff]  ;;  %s375_s6 = sshll.u32 %s372_s5, 4  ;;  %s639_s19 = scalar_lea.hbm %s874_s2, 64  ;;  %s376_s6 = int_to_ptr.hbm [resolvable:$true] %s375_s6 }
  0x32   : > { %v237_v26 = vld [vmem:[#allocation2 + $0x18] sm:$0xff]  ;;  %s633_s8 = sshra.s32 %s376_s6, 4  ;;  %s634_s8 = int_to_ptr.hbm [resolvable:$true] %s633_s8 }
  0x33   : > { %v238_v27 = vld [vmem:[#allocation2 + $0x8] sm:$0xff]  ;;  %s635_s16 = scalar_lea.hbm %s634_s8, 16  ;;  %p640_p8 = scmp.lt.s32.totalorder %s634_s8, %s874_s2 }
  0x34   : > { %p636_p5 = scmp.ne.s32.totalorder %s634_s8, %s635_s16  ;;  %p641_p10 = scmp.lt.s32.totalorder %s639_s19, %s635_s16 }
  0x36   : > { %p637_p6 = pnand %p636_p5, %p781_p9  ;;  %p642_p12 = por %p641_p10, %p640_p8 }
  0x37   : > { %262 = vperm.xlu1 %581, %v230_v5   ;;  %246 = vperm.xlu0 %580, %v230_v5  }
  0x38   : > { %p638_p7 = pneg %p637_p6 }
  0x39   : > { %286 = vperm.xlu2 %582, %v230_v5  }
  0x3a   : > { %p643_p13 = pnand %p642_p12, %p638_p7 }
  0x3f   : > { %584 = vset.pattern.permute.xlu1 %v709_v6  ;;  %583 = vset.pattern.permute.xlu0 %v709_v6 }
  0x40   : > { %274 = vperm.xlu1 %584, %v230_v5   ;;  %270 = vperm.xlu0 %583, %v229_v1  }
  0x41   : > { %585 = vset.pattern.permute.xlu2 %v710_v7 }
  0x42   : > { %294 = vperm.xlu2 %585, %v229_v1  }
  0x48   : > { %586 = vset.pattern.permute.xlu1 %v710_v7  ;;  %588 = vset.pattern.permute.xlu0 %v711_v8 }
  0x49   : > { %298 = vperm.xlu1 %586, %v230_v5   ;;  %314 = vperm.xlu0 %588, %v230_v5  }
  0x4a   : > { %587 = vset.pattern.permute.xlu2 %v711_v8 }
  0x4b   : > { %310 = vperm.xlu2 %587, %v229_v1  }
  0x8b   : > { %v283_v9 = vpop.permute.xlu2 %282 }
  0x93   : > { %v287_v12 = vpop.permute.xlu2 %286 }
  0x9c   : > { %v295_v19 = vpop.permute.xlu2 %294 }
  0xa1   : > { %v259_v10 = vpop.permute.xlu1 %258  ;;  %v242_v11 = vpop.permute.xlu0 %241 }
  0xa2   : > { %v265_v17 = vmul.f32 %v259_v10, %v235_v13  ;;  %v266_v18 = vmul.f32 %v259_v10, %v236_v14  ;;  %v249_v32 = vsub.f32 %v235_v13, %v242_v11  ;;  %v250_v33 = vsub.f32 %v236_v14, %v242_v11 }
  0xa4   : > { %v289_v20 = vmul.f32 %v283_v9, %v265_v17  ;;  %v290_v21 = vmul.f32 %v283_v9, %v266_v18  ;;  %v321_v35 = vsub.f32 %v265_v17, %v295_v19  ;;  %v322_v36 = vsub.f32 %v266_v18, %v295_v19 }
  0xa5   : > { %v311_v34 = vpop.permute.xlu2 %310  ;;  %vm253_vm0 = vcmp.gt.f32.partialorder %v249_v32, 0.0  ;;  %vm254_vm1 = vcmp.gt.f32.partialorder %v250_v33, 0.0 }
  0xa6   : > { %v301_v30 = vsub.f32 %v289_v20, %v295_v19  ;;  %v302_v31 = vsub.f32 %v290_v21, %v295_v19 }
  0xa9   : > { %v263_v15 = vpop.permute.xlu1 %262  ;;  %v822_v16 = vpop.permute.xlu0 %246 }
  0xaa   : > { %v267_v39 = vmul.f32 %v263_v15, %v237_v26  ;;  %v268_v40 = vmul.f32 %v263_v15, %v238_v27  ;;  %v251_v53 = vsub.f32 %v237_v26, %v822_v16  ;;  %v252_v54 = vsub.f32 %v238_v27, %v822_v16 }
  0xac   : > { %v291_v49 = vmul.f32 %v287_v12, %v267_v39  ;;  %v292_v50 = vmul.f32 %v287_v12, %v268_v40  ;;  %vm255_vm4 = vcmp.gt.f32.partialorder %v251_v53, 0.0  ;;  %vm256_vm5 = vcmp.gt.f32.partialorder %v252_v54, 0.0 }
  0xb2   : > { %v275_v24 = vpop.permute.xlu1 %274  ;;  %v271_v25 = vpop.permute.xlu0 %270 }
  0xb3   : > { %v277_v28 = vmul.f32 %v271_v25, %v231_v22  ;;  %v278_v29 = vmul.f32 %v271_v25, %v232_v23  ;;  %v279_v55 = vmul.f32 %v275_v24, %v233_v45  ;;  %v280_v56 = vmul.f32 %v275_v24, %v234_v46 }
  0xb5   : > { %v305_v37 = vadd.f32 %v301_v30, %v277_v28  ;;  %v306_v38 = vadd.f32 %v302_v31, %v278_v29  ;;  %v325_v41 = vadd.f32 %v321_v35, %v277_v28  ;;  %v326_v42 = vadd.f32 %v322_v36, %v278_v29 }
  0xb7   : > { %v317_v43 = vsub.f32 %v305_v37, %v311_v34  ;;  %v318_v44 = vsub.f32 %v306_v38, %v311_v34 }
  0xb9   : > { %v329_v47 = vsel %vm253_vm0, %v317_v43, %v325_v41  ;;  %v330_v48 = vsel %vm254_vm1, %v318_v44, %v326_v42 }
  0xba   : > { %v333_v51 = vsub.f32 %v329_v47, %v242_v11  ;;  %v334_v52 = vsub.f32 %v330_v48, %v242_v11  ;;  %341 = vst [vmem:[#allocation2 + $0x10] sm:$0xff] %v329_v47 }
  0xbb   : > { %342 = vst [vmem:[#allocation2] sm:$0xff] %v330_v48  ;;  %v299_v57 = vpop.permute.xlu1 %298  ;;  %v315_v1 = vpop.permute.xlu0 %314 }
  0xbc   : > { %vm337_vm2 = vcmp.gt.f32.partialorder %v333_v51, 0.0  ;;  %vm338_vm3 = vcmp.gt.f32.partialorder %v334_v52, 0.0  ;;  %v303_v58 = vsub.f32 %v291_v49, %v299_v57  ;;  %v304_v59 = vsub.f32 %v292_v50, %v299_v57 }
  0xbd   : > { %v494_v61 = vsel %vm337_vm2, 1.0, %v712_v60  ;;  %v495_v62 = vsel %vm338_vm3, 1.0, %v712_v60  ;;  %v323_v63 = vsub.f32 %v267_v39, %v299_v57  ;;  %v324_v0 = vsub.f32 %v268_v40, %v299_v57 }
  0xbe   : > { %v353_v2 = vpack.c.bf16 %v495_v62, %v494_v61  ;;  %v307_v3 = vadd.f32 %v303_v58, %v279_v55  ;;  %v308_v4 = vadd.f32 %v304_v59, %v280_v56 }
  0xbf   : > { %v327_v5 = vadd.f32 %v323_v63, %v279_v55  ;;  %v328_v6 = vadd.f32 %v324_v0, %v280_v56 }
  0xc0   : > { %355 = vst [vmem:[%s819_s30] sm:$0xff] %v353_v2  ;;  %v319_v7 = vsub.f32 %v307_v3, %v315_v1  ;;  %v320_v8 = vsub.f32 %v308_v4, %v315_v1 }
  0xc2   : > { %v331_v9 = vsel %vm255_vm4, %v319_v7, %v327_v5  ;;  %v332_v10 = vsel %vm256_vm5, %v320_v8, %v328_v6 }
  0xc3   : > { %v335_v11 = vsub.f32 %v331_v9, %v822_v16  ;;  %v336_v12 = vsub.f32 %v332_v10, %v822_v16  ;;  %343 = vst [vmem:[#allocation2 + $0x18] sm:$0xff] %v331_v9 }
  0xc4   : > { %344 = vst [vmem:[#allocation2 + $0x8] sm:$0xff] %v332_v10 }
  0xc5   : > { %vm339_vm6 = vcmp.gt.f32.partialorder %v335_v11, 0.0  ;;  %vm340_vm7 = vcmp.gt.f32.partialorder %v336_v12, 0.0 }
  0xc6   : > { %v496_v13 = vsel %vm339_vm6, 1.0, %v712_v60  ;;  %v497_v14 = vsel %vm340_vm7, 1.0, %v712_v60 }
  0xc7   : > { %v354_v15 = vpack.c.bf16 %v497_v14, %v496_v13 }
  0xc9   : > { %356 = vst [vmem:[%s819_s30 + $0x8] sm:$0xff] %v354_v15 }
  0xca   : > { %646 = shalt.err (!%p643_p13)
}
  0xcb   : > { %s713_s15 = smov 128   ;;  %s714_s27 = smov 8  }
  0xcc   : > { %508 = dma.vmem_to_hbm [thread:$0]  (%p781_p9), %s374_s12, 256, %s376_s6, %s358_s7, %s713_s15, %s713_s15, %s714_s27  }
  0xcd PF: > { %p519_p0 = scmp.ge.s32.totalorder %s701_s14, 2  ;;  %s390_s28 = sand.u32 1, %s681_s9  }
  0xce   : > { %s391_s29 = scalar_lea.sflag [#allocation5], %s390_s28 }
  0xcf   : > { %p515_p1 = pnand %p519_p0, %p788_p11 }
  0xd1   : > { %p516_p2 = pneg %p515_p1 }
  0xd3   : > { %676 = dma.done.wait (%p516_p2), %s391_s29, 256  }
  0xd4   : > { %678 = vsyncadd (%p516_p2), %s391_s29, 4294967040  ;;  %s18_s14 = sadd.s32 1, %s701_s14   ;;  %s879_s9 = smov %s685_s10 }
  0xd5   : > { %p15_p3 = scmp.ge.s32.totalorder %s18_s14, 6   ;;  %s880_s10 = smov %s689_s11 }
  0xd6   : > { %s881_s11 = smov %s786_s23  ;;  %s882_s12 = smov %s697_s13 }
  0xd7   : > { %s883_s13 = smov %s885_s17  ;;  %17 = sbr.rel (!%p15_p3) target bundleno = 6 (0x6), region = 80 }
  0xdc   :  { %397 = vsyncpa [#allocation4], 1 }
  0xdd   :  { %399 = vsyncpa [#allocation4 + $0x1], 1 }
  0xde   :  { %400 = vsyncpa [#allocation5], 1 }
  0xdf   :  { %402 = vsyncpa [#allocation5 + $0x1], 1 }

</bundles_post_ra>
